<compile_context>
chip_gen: v7x
topology: tpu7x:2x2x1
jax: 0.10.0
libtpu: 0.0.40
codegen_flags: <defaults>
</compile_context>

<pallas_src>
import jax
import jax.numpy as jnp
from jax.experimental import pallas as pl
from jax.experimental.pallas import tpu as pltpu


def _reward_mlp_kernel(h_ref, z_ref, w1h_ref, w1z_ref, b1_ref,
                       w2_ref, b2_ref, w3_ref, b3_ref, o_ref):
    # Layer 1: fused concat  ->  x @ W1 == h @ W1[:H] + z @ W1[H:]   (MXU, bf16 in, f32 acc)
    h1 = (jnp.dot(h_ref[...].astype(jnp.bfloat16), w1h_ref[...],
                  preferred_element_type=jnp.float32)
          + jnp.dot(z_ref[...].astype(jnp.bfloat16), w1z_ref[...],
                    preferred_element_type=jnp.float32)
          + b1_ref[...])                                   # bias + ReLU in f32 (VPU)
    h1 = jnp.maximum(h1, 0.0)

    # Layer 2: (block_b, U) x (U, U) on the MXU, f32 accumulation.
    h2 = jnp.dot(h1.astype(jnp.bfloat16), w2_ref[...],
                 preferred_element_type=jnp.float32) + b2_ref[...]
    h2 = jnp.maximum(h2, 0.0)

    # Layer 3 (U -> 1): VPU multiply + cross-lane reduce instead of an N=1 MXU pass.
    r = jnp.sum(h2 * w3_ref[...], axis=-1) + b3_ref[0]     # (block_b,)

    # Lane-dense store: batch lives on the lane axis of the output row.
    o_ref[...] = r.reshape(1, -1).astype(o_ref.dtype)


def reward_model_forward(h, z, kparams, *, block_b=None):
    """Pallas implementation of RewardModel.forward(h, z).

    h: (B, rnn_hidden_dim) float32
    z: (B, latent_dim)     float32
    kparams: output of prepare_kernel_params()
    returns: (B,) float32
    """
    w1h, w1z, b1, w2, b2, w3_row, b3 = kparams
    B, H = h.shape
    L = z.shape[1]
    U = w1h.shape[1]
    assert w1h.shape[0] == H and w1z.shape[0] == L

    if block_b is None:
        # Large enough to amortize ~0.35us/step, small enough that big batches
        # yield >=2 "parallel" grid steps (v7x has two TensorCores per chip).
        block_b = min(B, 256)
    assert B % block_b == 0, (B, block_b)
    # (8,128) rule: sublane block dim must be a multiple of 8 or the full dim.
    assert block_b % 8 == 0 or block_b == B, block_b
    num_blocks = B // block_b

    flops = 2 * B * ((H + L) * U + U * U + U)
    bytes_accessed = (
        4 * B * (H + L + 1)                                   # h, z, output (f32)
        + w1h.size * w1h.dtype.itemsize
        + w1z.size * w1z.dtype.itemsize
        + w2.size * w2.dtype.itemsize
        + 4 * (U + U + U + 1))                                # b1, b2, w3 row, b3 (f32)

    out = pl.pallas_call(
        _reward_mlp_kernel,
        out_shape=jax.ShapeDtypeStruct((num_blocks, block_b), jnp.float32),
        grid_spec=pltpu.PrefetchScalarGridSpec(
            num_scalar_prefetch=0,
            grid=(num_blocks,),
            in_specs=[
                pl.BlockSpec((block_b, H), lambda i: (i, 0)),        # h tile
                pl.BlockSpec((block_b, L), lambda i: (i, 0)),        # z tile
                pl.BlockSpec((H, U), lambda i: (0, 0)),              # W1[:H]  (resident, bf16)
                pl.BlockSpec((L, U), lambda i: (0, 0)),              # W1[H:]  (resident, bf16)
                pl.BlockSpec((1, U), lambda i: (0, 0)),              # b1      (f32)
                pl.BlockSpec((U, U), lambda i: (0, 0)),              # W2      (resident, bf16)
                pl.BlockSpec((1, U), lambda i: (0, 0)),              # b2      (f32)
                pl.BlockSpec((1, U), lambda i: (0, 0)),              # w3 row  (f32, VPU)
                pl.BlockSpec(memory_space=pltpu.MemorySpace.SMEM),   # b3 scalar (SMEM)
            ],
            out_specs=pl.BlockSpec((1, block_b), lambda i: (i, 0)),  # lane-dense row
        ),
        compiler_params=pltpu.CompilerParams(
            dimension_semantics=("parallel",),
        ),
        cost_estimate=pl.CostEstimate(
            flops=flops, transcendentals=0, bytes_accessed=bytes_accessed),
    )(h, z, w1h, w1z, b1, w2, b2, w3_row, b3)

    return out.reshape(B)                                    # .squeeze(-1)


def init_reward_model_params(key, rnn_hidden_dim, latent_dim, hidden_units=256):
    """Deterministic init mimicking nn.Linear default (uniform +-1/sqrt(fan_in)).

    Weights are stored (in_features, out_features) — the transpose of
    PyTorch's nn.Linear.weight — so the kernel does plain x @ W + b.
    """
    d_in = rnn_hidden_dim + latent_dim
    dims = [(d_in, hidden_units), (hidden_units, hidden_units), (hidden_units, 1)]
    params = []
    for fan_in, fan_out in dims:
        key, kw, kb = jax.random.split(key, 3)
        bound = 1.0 / jnp.sqrt(fan_in)
        w = jax.random.uniform(kw, (fan_in, fan_out), jnp.float32, -bound, bound)
        b = jax.random.uniform(kb, (fan_out,), jnp.float32, -bound, bound)
        params += [w, b]
    return tuple(params)


def prepare_kernel_params(params, rnn_hidden_dim, *, matmul_dtype=jnp.bfloat16):
    """One-time repack: split W1 into [h-part; z-part], cast big MXU weights to
    bf16 (v6e/v7x native rate, half the DMA), keep biases + final row in f32."""
    w1, b1, w2, b2, w3, b3 = params
    w1h = w1[:rnn_hidden_dim].astype(matmul_dtype)           # (H, U)
    w1z = w1[rnn_hidden_dim:].astype(matmul_dtype)           # (L, U)
    return (
        w1h,
        w1z,
        b1.reshape(1, -1).astype(jnp.float32),               # (1, U)
        w2.astype(matmul_dtype),                             # (U, U)
        b2.reshape(1, -1).astype(jnp.float32),               # (1, U)
        w3.reshape(1, -1).astype(jnp.float32),               # (1, U)  — VPU path, f32
        b3.reshape(-1).astype(jnp.float32),                  # (1,)    — SMEM scalar
    )


def _reference_forward(h, z, kparams):
    """Pure-JAX reference mirroring the kernel math (same bf16 weights, f32 acc)."""
    w1h, w1z, b1, w2, b2, w3_row, b3 = kparams
    h1 = (jnp.dot(h.astype(w1h.dtype), w1h, preferred_element_type=jnp.float32)
          + jnp.dot(z.astype(w1z.dtype), w1z, preferred_element_type=jnp.float32)
          + b1)
    h1 = jnp.maximum(h1, 0.0)
    h2 = jnp.dot(h1.astype(w2.dtype), w2, preferred_element_type=jnp.float32) + b2
    h2 = jnp.maximum(h2, 0.0)
    return jnp.sum(h2 * w3_row, axis=-1) + b3[0]


if __name__ == "__main__":
    rnn_hidden_dim = 32
    latent_dim = 32
    hidden_units = 256
    batch = 8

    key = jax.random.PRNGKey(0)
    k_h, k_z, k_p = jax.random.split(key, 3)
    h = jax.random.normal(k_h, (batch, rnn_hidden_dim), jnp.float32)
    z = jax.random.normal(k_z, (batch, latent_dim), jnp.float32)

    torch_like_params = init_reward_model_params(
        k_p, rnn_hidden_dim, latent_dim, hidden_units)
    kparams = prepare_kernel_params(torch_like_params, rnn_hidden_dim)

    out = reward_model_forward(h, z, kparams)
    out = jax.block_until_ready(out)

    ref = _reference_forward(h, z, kparams)
    assert out.shape == (batch,), out.shape
    assert jnp.allclose(out, ref, atol=1e-3, rtol=1e-3), (out, ref)

    print("KERNEL_OK")
</pallas_src>

<mosaic_0001>
module attributes {stable_mosaic.version = 11 : i64} {
  func.func @_reward_mlp_kernel(%arg0: i32, %arg1: memref<8x32xf32, #tpu.memory_space<vmem>>, %arg2: memref<8x32xf32, #tpu.memory_space<vmem>>, %arg3: memref<32x256xbf16, #tpu.memory_space<vmem>>, %arg4: memref<32x256xbf16, #tpu.memory_space<vmem>>, %arg5: memref<1x256xf32, #tpu.memory_space<vmem>>, %arg6: memref<256x256xbf16, #tpu.memory_space<vmem>>, %arg7: memref<1x256xf32, #tpu.memory_space<vmem>>, %arg8: memref<1x256xf32, #tpu.memory_space<vmem>>, %arg9: memref<1xf32, #tpu.memory_space<smem>>, %arg10: memref<1x8xf32, #tpu.memory_space<vmem>>) attributes {dimension_semantics = [#tpu.dimension_semantics<parallel>], iteration_bounds = array<i64: 1>, scalar_prefetch = 0 : i64, scratch_operands = 0 : i64, tpu.core_type = #tpu.core_type<tc>, window_params = [{transform_indices = @transform_0, window_bounds = array<i64: 8, 32>}, {transform_indices = @transform_1, window_bounds = array<i64: 8, 32>}, {pipeline_mode = #tpu.pipeline_mode<synchronous>, transform_indices = @transform_2, window_bounds = array<i64: 32, 256>}, {pipeline_mode = #tpu.pipeline_mode<synchronous>, transform_indices = @transform_3, window_bounds = array<i64: 32, 256>}, {pipeline_mode = #tpu.pipeline_mode<synchronous>, transform_indices = @transform_4, window_bounds = array<i64: 1, 256>}, {pipeline_mode = #tpu.pipeline_mode<synchronous>, transform_indices = @transform_5, window_bounds = array<i64: 256, 256>}, {pipeline_mode = #tpu.pipeline_mode<synchronous>, transform_indices = @transform_6, window_bounds = array<i64: 1, 256>}, {pipeline_mode = #tpu.pipeline_mode<synchronous>, transform_indices = @transform_7, window_bounds = array<i64: 1, 256>}, {transform_indices = @transform_8, window_bounds = array<i64: 1>}, {transform_indices = @transform_9, window_bounds = array<i64: 1, 8>}]} {
    %c0 = arith.constant 0 : index
    %c0_0 = arith.constant 0 : index
    %0 = vector.load %arg1[%c0, %c0_0] : memref<8x32xf32, #tpu.memory_space<vmem>>, vector<8x32xf32>
    %1 = arith.truncf %0 : vector<8x32xf32> to vector<8x32xbf16>
    %c0_1 = arith.constant 0 : index
    %c0_2 = arith.constant 0 : index
    %2 = vector.load %arg3[%c0_1, %c0_2] : memref<32x256xbf16, #tpu.memory_space<vmem>>, vector<32x256xbf16>
    %cst = arith.constant dense<0.000000e+00> : vector<8x256xf32>
    %3 = tpu.matmul %1, %2, %cst {dimension_numbers = #tpu.dot_dimension_numbers<[1], [0], [0], [1], [0, 0, 1, 1], [], []>} : vector<8x32xbf16>, vector<32x256xbf16>, vector<8x256xf32> -> vector<8x256xf32>
    %c0_3 = arith.constant 0 : index
    %c0_4 = arith.constant 0 : index
    %4 = vector.load %arg2[%c0_3, %c0_4] : memref<8x32xf32, #tpu.memory_space<vmem>>, vector<8x32xf32>
    %5 = arith.truncf %4 : vector<8x32xf32> to vector<8x32xbf16>
    %c0_5 = arith.constant 0 : index
    %c0_6 = arith.constant 0 : index
    %6 = vector.load %arg4[%c0_5, %c0_6] : memref<32x256xbf16, #tpu.memory_space<vmem>>, vector<32x256xbf16>
    %cst_7 = arith.constant dense<0.000000e+00> : vector<8x256xf32>
    %7 = tpu.matmul %5, %6, %cst_7 {dimension_numbers = #tpu.dot_dimension_numbers<[1], [0], [0], [1], [0, 0, 1, 1], [], []>} : vector<8x32xbf16>, vector<32x256xbf16>, vector<8x256xf32> -> vector<8x256xf32>
    %8 = arith.addf %3, %7 : vector<8x256xf32>
    %c0_8 = arith.constant 0 : index
    %c0_9 = arith.constant 0 : index
    %9 = vector.load %arg5[%c0_8, %c0_9] : memref<1x256xf32, #tpu.memory_space<vmem>>, vector<1x256xf32>
    %10 = vector.broadcast %9 : vector<1x256xf32> to vector<8x256xf32>
    %11 = arith.addf %8, %10 : vector<8x256xf32>
    %cst_10 = arith.constant 0.000000e+00 : f32
    %12 = vector.broadcast %cst_10 : f32 to vector<8x256xf32>
    %13 = arith.maximumf %11, %12 : vector<8x256xf32>
    %14 = arith.truncf %13 : vector<8x256xf32> to vector<8x256xbf16>
    %c0_11 = arith.constant 0 : index
    %c0_12 = arith.constant 0 : index
    %15 = vector.load %arg6[%c0_11, %c0_12] : memref<256x256xbf16, #tpu.memory_space<vmem>>, vector<256x256xbf16>
    %cst_13 = arith.constant dense<0.000000e+00> : vector<8x256xf32>
    %16 = tpu.matmul %14, %15, %cst_13 {dimension_numbers = #tpu.dot_dimension_numbers<[1], [0], [0], [1], [0, 0, 1, 1], [], []>} : vector<8x256xbf16>, vector<256x256xbf16>, vector<8x256xf32> -> vector<8x256xf32>
    %c0_14 = arith.constant 0 : index
    %c0_15 = arith.constant 0 : index
    %17 = vector.load %arg7[%c0_14, %c0_15] : memref<1x256xf32, #tpu.memory_space<vmem>>, vector<1x256xf32>
    %18 = vector.broadcast %17 : vector<1x256xf32> to vector<8x256xf32>
    %19 = arith.addf %16, %18 : vector<8x256xf32>
    %cst_16 = arith.constant 0.000000e+00 : f32
    %20 = vector.broadcast %cst_16 : f32 to vector<8x256xf32>
    %21 = arith.maximumf %19, %20 : vector<8x256xf32>
    %c0_17 = arith.constant 0 : index
    %c0_18 = arith.constant 0 : index
    %22 = vector.load %arg8[%c0_17, %c0_18] : memref<1x256xf32, #tpu.memory_space<vmem>>, vector<1x256xf32>
    %23 = vector.broadcast %22 : vector<1x256xf32> to vector<8x256xf32>
    %24 = arith.mulf %21, %23 : vector<8x256xf32>
    %cst_19 = arith.constant dense<0.000000e+00> : vector<8xf32>
    %25 = vector.multi_reduction <add>, %24, %cst_19 [1] : vector<8x256xf32> to vector<8xf32>
    %c0_20 = arith.constant 0 : index
    %26 = memref.load %arg9[%c0_20] : memref<1xf32, #tpu.memory_space<smem>>
    %27 = vector.broadcast %26 : f32 to vector<8xf32>
    %28 = arith.addf %25, %27 : vector<8xf32>
    %29 = vector.shape_cast %28 : vector<8xf32> to vector<1x8xf32>
    %c0_21 = arith.constant 0 : index
    %c0_22 = arith.constant 0 : index
    %30 = vector.load %arg10[%c0_21, %c0_22] : memref<1x8xf32, #tpu.memory_space<vmem>>, vector<1x8xf32>
    tpu.vector_store %arg10[%c0_21, %c0_22], %29 {strides = array<i32>} : memref<1x8xf32, #tpu.memory_space<vmem>>, vector<1x8xf32>,
    return
  }
  func.func @transform_0(%arg0: i32) -> (i32, i32) {
    %c0_i32 = arith.constant 0 : i32
    %c0_i32_0 = arith.constant 0 : i32
    return %arg0, %c0_i32 : i32, i32
  }
  func.func @transform_1(%arg0: i32) -> (i32, i32) {
    %c0_i32 = arith.constant 0 : i32
    %c0_i32_0 = arith.constant 0 : i32
    return %arg0, %c0_i32 : i32, i32
  }
  func.func @transform_2(%arg0: i32) -> (i32, i32) {
    %c0_i32 = arith.constant 0 : i32
    %c0_i32_0 = arith.constant 0 : i32
    %c0_i32_1 = arith.constant 0 : i32
    return %c0_i32, %c0_i32_0 : i32, i32
  }
  func.func @transform_3(%arg0: i32) -> (i32, i32) {
    %c0_i32 = arith.constant 0 : i32
    %c0_i32_0 = arith.constant 0 : i32
    %c0_i32_1 = arith.constant 0 : i32
    return %c0_i32, %c0_i32_0 : i32, i32
  }
  func.func @transform_4(%arg0: i32) -> (i32, i32) {
    %c0_i32 = arith.constant 0 : i32
    %c0_i32_0 = arith.constant 0 : i32
    %c0_i32_1 = arith.constant 0 : i32
    return %c0_i32, %c0_i32_0 : i32, i32
  }
  func.func @transform_5(%arg0: i32) -> (i32, i32) {
    %c0_i32 = arith.constant 0 : i32
    %c0_i32_0 = arith.constant 0 : i32
    %c0_i32_1 = arith.constant 0 : i32
    return %c0_i32, %c0_i32_0 : i32, i32
  }
  func.func @transform_6(%arg0: i32) -> (i32, i32) {
    %c0_i32 = arith.constant 0 : i32
    %c0_i32_0 = arith.constant 0 : i32
    %c0_i32_1 = arith.constant 0 : i32
    return %c0_i32, %c0_i32_0 : i32, i32
  }
  func.func @transform_7(%arg0: i32) -> (i32, i32) {
    %c0_i32 = arith.constant 0 : i32
    %c0_i32_0 = arith.constant 0 : i32
    %c0_i32_1 = arith.constant 0 : i32
    return %c0_i32, %c0_i32_0 : i32, i32
  }
  func.func @transform_8(%arg0: i32) -> i32 {
    %c0_i32 = arith.constant 0 : i32
    %c0_i32_0 = arith.constant 0 : i32
    return %c0_i32 : i32
  }
  func.func @transform_9(%arg0: i32) -> (i32, i32) {
    %c0_i32 = arith.constant 0 : i32
    %c0_i32_0 = arith.constant 0 : i32
    return %arg0, %c0_i32 : i32, i32
  }
}

</mosaic_0001>

<bundles_post_ra>
// kernel: tpu_custom_call.1
= control target key start
LH: loop header
LB: loop body
LE: loop exit
PB: predicated region body
PF: predicated region fallthrough
CT: control target
= control target key end

     0   :  { %15 = vsyncpa [#allocation4], 0  ;;  %s957_s0 = inlined_call_operand.hbm [shape: f32[8,32], index: 0, kind: input, shape index: {}]   ;;  %s958_s1 = inlined_call_operand.hbm [shape: f32[8,32], index: 1, kind: input, shape index: {}]   ;;  %s959_s2 = inlined_call_operand.hbm [shape: bf16[32,256], index: 2, kind: input, shape index: {}]   ;;  %s960_s3 = inlined_call_operand.hbm [shape: bf16[32,256], index: 3, kind: input, shape index: {}]   ;;  %s961_s4 = inlined_call_operand.vmem [shape: f32[1,256], index: 4, kind: input, shape index: {}]   ;;  %s962_s5 = inlined_call_operand.hbm [shape: bf16[256,256], index: 5, kind: input, shape index: {}]   ;;  %s963_s6 = inlined_call_operand.vmem [shape: f32[1,256], index: 6, kind: input, shape index: {}]   ;;  %s964_s7 = inlined_call_operand.vmem [shape: f32[1,256], index: 7, kind: input, shape index: {}]   ;;  %s965_s8 = inlined_call_operand.<no memory space> [shape: f32[1], index: 8, kind: input, shape index: {}]   ;;  %s966_s9 = inlined_call_operand.hbm [shape: f32[1,8], index: 9, kind: output, shape index: {}]  }
   0x1   :  { %16 = vsyncpa [#allocation7], 0 }
   0x2   :  { %17 = vsyncpa [#allocation10], 0 }
   0x3   :  { %18 = vsyncpa [#allocation5], 0  ;;  %s803_s30 = smov [#allocation6]   ;;  %s663_s13 = scalar_lea.hbm %s958_s1, 128 }
   0x4   :  { %s35_s10 = sshll.u32 %s803_s30, 4  ;;  %p664_p0 = scmp.ne.s32.totalorder %s958_s1, %s663_s13  ;;  %s36_s10 = int_to_ptr.vmem [resolvable:$true] %s35_s10 }
   0x5   :  { %p667_p1 = scmp.lt.u32.totalorder %s663_s13, %s958_s1 }
   0x7   :  { %p669_p2 = pnand %p667_p1, %p664_p0 }
   0x9   :  { %672 = shalt.err (!%p669_p2)
}
   0xa   :  { %s673_s18 = scalar_lea.vmem %s36_s10, 128  ;;  %p678_p4 = scmp.lt.s32.totalorder %s36_s10, %s36_s10 }
   0xb   :  { %p674_p3 = scmp.ne.s32.totalorder %s36_s10, %s673_s18  ;;  %p679_p5 = scmp.lt.s32.totalorder %s673_s18, %s673_s18 }
   0xd   :  { %p680_p6 = por %p679_p5, %p678_p4 }
   0xf   :  { %p681_p7 = pnand %p680_p6, %p674_p3 }
  0x11   :  { %684 = shalt.err (!%p681_p7)
}
  0x12   :  { %38 = dma.hbm_to_vmem [thread:$0]  %s958_s1, 128, %s36_s10, [#allocation7]  }
  0x13   :  { %s804_s21 = smov [#allocation9]   ;;  %s805_s23 = smov [#allocation3]  }
  0x14   :  { %s56_s22 = sshll.u32 %s804_s21, 4  ;;  %s25_s24 = sshll.u32 %s805_s23, 4  ;;  %s57_s22 = int_to_ptr.vmem [resolvable:$true] %s56_s22  ;;  %s26_s24 = int_to_ptr.vmem [resolvable:$true] %s25_s24 }
  0x15   :  { %s685_s27 = scalar_lea.hbm %s960_s3, 512 }
  0x16   :  { %p686_p8 = scmp.ne.s32.totalorder %s960_s3, %s685_s27  ;;  %p689_p9 = scmp.lt.u32.totalorder %s685_s27, %s960_s3 }
  0x18   :  { %p691_p10 = pnand %p689_p9, %p686_p8 }
  0x1a   :  { %694 = shalt.err (!%p691_p10)
}
  0x1b   :  { %s695_s1 = scalar_lea.vmem %s57_s22, 512  ;;  %p700_p12 = scmp.lt.s32.totalorder %s57_s22, %s57_s22 }
  0x1c   :  { %p696_p11 = scmp.ne.s32.totalorder %s57_s22, %s695_s1  ;;  %p701_p13 = scmp.lt.s32.totalorder %s695_s1, %s695_s1 }
  0x1e   :  { %p702_p0 = por %p701_p13, %p700_p12 }
  0x20   :  { %p703_p1 = pnand %p702_p0, %p696_p11 }
  0x22   :  { %706 = shalt.err (!%p703_p1)
}
  0x23   :  { %s806_s10 = smov 128   ;;  %s807_s12 = smov 8  }
  0x24   :  { %62 = dma.hbm_to_vmem [thread:$0]  %s960_s3, 512, %s57_s22, [#allocation10], %s806_s10, %s806_s10, %s807_s12  }
  0x25   :  { %s707_s17 = scalar_lea.hbm %s957_s0, 128 }
  0x26   :  { %p708_p2 = scmp.ne.s32.totalorder %s957_s0, %s707_s17  ;;  %p711_p3 = scmp.lt.u32.totalorder %s707_s17, %s957_s0 }
  0x28   :  { %p713_p4 = pnand %p711_p3, %p708_p2 }
  0x2a   :  { %716 = shalt.err (!%p713_p4)
}
  0x2b   :  { %s717_s23 = scalar_lea.vmem %s26_s24, 128  ;;  %p722_p6 = scmp.lt.s32.totalorder %s26_s24, %s26_s24 }
  0x2c   :  { %p718_p5 = scmp.ne.s32.totalorder %s26_s24, %s717_s23  ;;  %p723_p7 = scmp.lt.s32.totalorder %s717_s23, %s717_s23 }
  0x2e   :  { %p724_p8 = por %p723_p7, %p722_p6 }
  0x30   :  { %p725_p9 = pnand %p724_p8, %p718_p5 }
  0x32   :  { %728 = shalt.err (!%p725_p9)
}
  0x33   :  { %28 = dma.hbm_to_vmem [thread:$0]  %s957_s0, 128, %s26_s24, [#allocation4]  }
  0x34   :  { %s808_s25 = smov [#allocation8]   ;;  %s809_s27 = smov [#allocation11]  }
  0x35   :  { %s44_s26 = sshll.u32 %s808_s25, 4  ;;  %s70_s28 = sshll.u32 %s809_s27, 4  ;;  %s45_s26 = int_to_ptr.vmem [resolvable:$true] %s44_s26  ;;  %s71_s28 = int_to_ptr.vmem [resolvable:$true] %s70_s28 }
  0x36   :  { %s729_s11 = scalar_lea.hbm %s959_s2, 512 }
  0x37   :  { %p730_p10 = scmp.ne.s32.totalorder %s959_s2, %s729_s11  ;;  %p733_p11 = scmp.lt.u32.totalorder %s729_s11, %s959_s2 }
  0x39   :  { %p735_p12 = pnand %p733_p11, %p730_p10 }
  0x3b   :  { %738 = shalt.err (!%p735_p12)
}
  0x3c   :  { %s739_s0 = scalar_lea.vmem %s45_s26, 512  ;;  %p744_p0 = scmp.lt.s32.totalorder %s45_s26, %s45_s26 }
  0x3d   :  { %p740_p13 = scmp.ne.s32.totalorder %s45_s26, %s739_s0  ;;  %p745_p1 = scmp.lt.s32.totalorder %s739_s0, %s739_s0 }
  0x3f   :  { %p746_p2 = por %p745_p1, %p744_p0 }
  0x41   :  { %p747_p3 = pnand %p746_p2, %p740_p13 }
  0x43   :  { %750 = shalt.err (!%p747_p3)
}
  0x44   :  { %50 = dma.hbm_to_vmem [thread:$0]  %s959_s2, 512, %s45_s26, [#allocation7], %s806_s10, %s806_s10, %s807_s12  }
  0x45   :  { %s751_s19 = scalar_lea.hbm %s962_s5, 4096 }
  0x46   :  { %p752_p4 = scmp.ne.s32.totalorder %s962_s5, %s751_s19  ;;  %p755_p5 = scmp.lt.u32.totalorder %s751_s19, %s962_s5 }
  0x48   :  { %p757_p6 = pnand %p755_p5, %p752_p4 }
  0x4a   :  { %760 = shalt.err (!%p757_p6)
}
  0x4b   :  { %s761_s22 = scalar_lea.vmem %s71_s28, 4096  ;;  %p766_p8 = scmp.lt.s32.totalorder %s71_s28, %s71_s28 }
  0x4c   :  { %p762_p7 = scmp.ne.s32.totalorder %s71_s28, %s761_s22  ;;  %p767_p9 = scmp.lt.s32.totalorder %s761_s22, %s761_s22 }
  0x4e   :  { %p768_p10 = por %p767_p9, %p766_p8 }
  0x50   :  { %p769_p11 = pnand %p768_p10, %p762_p7 }
  0x52   :  { %772 = shalt.err (!%p769_p11)
}
  0x53   :  { %76 = dma.hbm_to_vmem [thread:$0]  %s962_s5, 4096, %s71_s28, [#allocation10], %s806_s10, %s806_s10, %s807_s12  }
  0x54   :  { %795 = dma.done.wait [#allocation4], 128  }
  0x55   :  { %796 = vsyncadd [#allocation4], 4294967168 }
  0x56   :  { %797 = dma.done.wait [#allocation7], 640  }
  0x57   :  { %798 = vsyncadd [#allocation7], 4294966656 }
  0x58   :  { %799 = dma.done.wait [#allocation10], 4608  }
  0x59   :  { %800 = vsyncadd [#allocation10], 4294962688  ;;  %v810_v0 = vmov 0   ;;  %v603_v1 = vld [vmem:[#allocation9 + $0x4] ss:$8 sps:$4 sm:$0xff]   ;;  %v105_v5 = vld [vmem:[#allocation6] sm:$0xff]  ;;  %v242_v45 = vlaneseq }
  0x5a   :  { %167 = vmatprep.mubr.bf16.mxu1 %v810_v0  ;;  %v605_v2 = vld [vmem:[#allocation9] ss:$8 sps:$4 sm:$0xff]   ;;  %135 = vmatprep.subr.bf16.mxu1 %v603_v1  ;;  %v606_v3 = vld [vmem:[#allocation9 + $0x14] ss:$8 sps:$4 sm:$0xff]   ;;  %v608_v4 = vld [vmem:[#allocation9 + $0x10] ss:$8 sps:$4 sm:$0xff]   ;;  %v106_v8 = vpack.c.bf16 %v105_v5, %v105_v5 }
  0x5b   :  { %136 = vmatpush1.bf16.msra.mxu1 %v605_v2  ;;  %v611_v6 = vld [vmem:[#allocation8 + $0x4] ss:$8 sps:$4 sm:$0xff]   ;;  %v609_v7 = vld [vmem:[#allocation8] ss:$8 sps:$4 sm:$0xff]   ;;  %vm131_vm0 = vcmask 261120   ;;  %v99_v16 = vld [vmem:[#allocation3] sm:$0xff] }
  0x5c   :  { %137 = vmatprep.subr.bf16.mxu1 %v606_v3  ;;  %v615_v9 = vld [vmem:[#allocation11 + $0x4] ss:$8 sps:$4 sm:$0xff]   ;;  %v617_v10 = vld [vmem:[#allocation11] ss:$8 sps:$4 sm:$0xff]   ;;  %v614_v11 = vld [vmem:[#allocation8 + $0x14] ss:$8 sps:$4 sm:$0xff]   ;;  %v100_v18 = vpack.c.bf16 %v99_v16, %v99_v16 }
  0x5d   :  { %462 = vmatprep.subr.bf16.mxu0 %v615_v9  ;;  %v618_v12 = vld [vmem:[#allocation11 + $0x14] ss:$8 sps:$4 sm:$0xff]   ;;  %v612_v13 = vld [vmem:[#allocation8 + $0x10] ss:$8 sps:$4 sm:$0xff]   ;;  %v621_v15 = vld [vmem:[#allocation11 + $0x24] ss:$8 sps:$4 sm:$0xff]  }
  0x5e   :  { %463 = vmatpush1.bf16.msra.mxu0 %v617_v10  ;;  %v620_v14 = vld [vmem:[#allocation11 + $0x10] ss:$8 sps:$4 sm:$0xff]   ;;  %v623_v17 = vld [vmem:[#allocation11 + $0x20] ss:$8 sps:$4 sm:$0xff]   ;;  %v624_v19 = vld [vmem:[#allocation11 + $0x34] ss:$8 sps:$4 sm:$0xff]  }
  0x5f   :  { %138 = vmatpush1.bf16.msra.mxu1 %v608_v4  ;;  %464 = vmatprep.subr.bf16.mxu0 %v618_v12  ;;  %v626_v20 = vld [vmem:[#allocation11 + $0x30] ss:$8 sps:$4 sm:$0xff]   ;;  %v627_v21 = vld [vmem:[#allocation11 + $0x44] ss:$8 sps:$4 sm:$0xff]   ;;  %v629_v22 = vld [vmem:[#allocation11 + $0x40] ss:$8 sps:$4 sm:$0xff]  }
  0x60   :  { %199 = vmatprep.subr.bf16.mxu1 %v611_v6  ;;  %v630_v23 = vld [vmem:[#allocation11 + $0x54] ss:$8 sps:$4 sm:$0xff]   ;;  %v632_v24 = vld [vmem:[#allocation11 + $0x50] ss:$8 sps:$4 sm:$0xff]   ;;  %v633_v25 = vld [vmem:[#allocation11 + $0x64] ss:$8 sps:$4 sm:$0xff]  }
  0x61   :  { %v635_v26 = vld [vmem:[#allocation11 + $0x60] ss:$8 sps:$4 sm:$0xff]   ;;  %v636_v27 = vld [vmem:[#allocation11 + $0x74] ss:$8 sps:$4 sm:$0xff]   ;;  %v638_v28 = vld [vmem:[#allocation11 + $0x70] ss:$8 sps:$4 sm:$0xff]  }
  0x62   :  { %556 = vmatmul.mubr.msk.bf16.vlgmr.msra.gmra.mrb[0].mxu1 %vm131_vm0, %v106_v8  ;;  %465 = vmatpush1.bf16.msra.mxu0 %v620_v14  ;;  %v639_v29 = vld [vmem:[#allocation11 + $0x84] ss:$8 sps:$4 sm:$0xff]   ;;  %v641_v30 = vld [vmem:[#allocation11 + $0x80] ss:$8 sps:$4 sm:$0xff]   ;;  %v642_v31 = vld [vmem:[#allocation11 + $0x94] ss:$8 sps:$4 sm:$0xff]  }
  0x63   :  { %200 = vmatpush1.bf16.msra.mxu1 %v609_v7  ;;  %231 = vmatprep.mubr.bf16.mxu1 %v810_v0  ;;  %v644_v32 = vld [vmem:[#allocation11 + $0x90] ss:$8 sps:$4 sm:$0xff]   ;;  %v645_v33 = vld [vmem:[#allocation11 + $0xa4] ss:$8 sps:$4 sm:$0xff]   ;;  %v647_v34 = vld [vmem:[#allocation11 + $0xa0] ss:$8 sps:$4 sm:$0xff]  }
  0x64   :  { %201 = vmatprep.subr.bf16.mxu1 %v614_v11  ;;  %466 = vmatprep.subr.bf16.mxu0 %v621_v15  ;;  %v648_v35 = vld [vmem:[#allocation11 + $0xb4] ss:$8 sps:$4 sm:$0xff]   ;;  %v650_v36 = vld [vmem:[#allocation11 + $0xb0] ss:$8 sps:$4 sm:$0xff]   ;;  %v651_v37 = vld [vmem:[#allocation11 + $0xc4] ss:$8 sps:$4 sm:$0xff]  }
  0x65   :  { %v653_v38 = vld [vmem:[#allocation11 + $0xc0] ss:$8 sps:$4 sm:$0xff]   ;;  %v654_v39 = vld [vmem:[#allocation11 + $0xd4] ss:$8 sps:$4 sm:$0xff]   ;;  %v656_v40 = vld [vmem:[#allocation11 + $0xd0] ss:$8 sps:$4 sm:$0xff]  }
  0x66   :  { %467 = vmatpush1.bf16.msra.mxu0 %v623_v17  ;;  %v657_v41 = vld [vmem:[#allocation11 + $0xe4] ss:$8 sps:$4 sm:$0xff]   ;;  %v659_v42 = vld [vmem:[#allocation11 + $0xe0] ss:$8 sps:$4 sm:$0xff]   ;;  %v660_v43 = vld [vmem:[#allocation11 + $0xf4] ss:$8 sps:$4 sm:$0xff]  }
  0x67   :  { %202 = vmatpush1.bf16.msra.mxu1 %v612_v13  ;;  %468 = vmatprep.subr.bf16.mxu0 %v624_v19  ;;  %v662_v44 = vld [vmem:[#allocation11 + $0xf0] ss:$8 sps:$4 sm:$0xff]   ;;  %v243_v46 = vshrl.u32 %v242_v45, 7  ;;  %vm533_vm1 = vcmask 57344  }
  0x68   :  { %v240_v52 = vld [vmem:[%s961_s4] sm:$0x3] }
  0x69   :  { %v244_v51 = vsub.s32 0, %v243_v46  ;;  %v248_v53 = vsub.s32 1, %v243_v46  ;;  %v290_v4 = vld [vmem:[%s963_s6] sm:$0x3] }
  0x6a   :  { %561 = vmatmul.mubr.msk.bf16.vlgmr.msra.gmra.mrb[4].mxu1 %vm131_vm0, %v100_v18  ;;  %469 = vmatpush1.bf16.msra.mxu0 %v626_v20  ;;  %v505_v7 = vld [vmem:[%s964_s7] sm:$0x3]  ;;  %s811_s7 = smov [#allocation12]  }
  0x6b   :  { %470 = vmatprep.subr.bf16.mxu0 %v627_v21  ;;  %v245_v54 = vrot.slane %v240_v52, %v244_v51  ;;  %v249_v56 = vrot.slane %v240_v52, %v248_v53  ;;  %v295_v5 = vrot.slane %v290_v4, %v244_v51  ;;  %v299_v6 = vrot.slane %v290_v4, %v248_v53  ;;  %s541_s29 = sshll.u32 %s811_s7, 4  ;;  %s542_s29 = int_to_ptr.vmem [resolvable:$true] %s541_s29 }
  0x6c   :  { %v510_v11 = vrot.slane %v505_v7, %v244_v51  ;;  %v514_v14 = vrot.slane %v505_v7, %v248_v53  ;;  %v527_v21 = vand.u32 127, %v242_v45  ;;  %s773_s30 = scalar_lea.vmem %s542_s29, 16  ;;  %s777_s11 = scalar_lea.vmem %s542_s29, 32 }
  0x6d   :  { %p774_p12 = scmp.ne.s32.totalorder %s542_s29, %s773_s30  ;;  %p778_p13 = scmp.lt.s32.totalorder %s542_s29, %s542_s29 }
  0x6e   :  { %471 = vmatpush1.bf16.msra.mxu0 %v629_v22  ;;  %v523_v22 = vstv %s965_s8  ;;  %p779_p0 = scmp.lt.s32.totalorder %s777_s11, %s773_s30 }
  0x6f   :  { %472 = vmatprep.subr.bf16.mxu0 %v630_v23  ;;  %v530_v23 = vsub.s32 %v527_v21, %v243_v46 }
  0x70   :  { %p780_p1 = por %p779_p0, %p778_p13 }
  0x72   :  { %473 = vmatpush1.bf16.msra.mxu0 %v632_v24  ;;  %p781_p2 = pnand %p780_p1, %p774_p12 }
  0x73   :  { %474 = vmatprep.subr.bf16.mxu0 %v633_v25 }
  0x76   :  { %475 = vmatpush1.bf16.msra.mxu0 %v635_v26 }
  0x77   :  { %476 = vmatprep.subr.bf16.mxu0 %v636_v27 }
  0x7a   :  { %477 = vmatpush1.bf16.msra.mxu0 %v638_v28 }
  0x7b   :  { %478 = vmatprep.subr.bf16.mxu0 %v639_v29 }
  0x7e   :  { %479 = vmatpush1.bf16.msra.mxu0 %v641_v30 }
  0x7f   :  { %480 = vmatprep.subr.bf16.mxu0 %v642_v31 }
  0x82   :  { %481 = vmatpush1.bf16.msra.mxu0 %v644_v32 }
  0x83   :  { %482 = vmatprep.subr.bf16.mxu0 %v645_v33 }
  0x86   :  { %483 = vmatpush1.bf16.msra.mxu0 %v647_v34 }
  0x87   :  { %484 = vmatprep.subr.bf16.mxu0 %v648_v35 }
  0x8a   :  { %485 = vmatpush1.bf16.msra.mxu0 %v650_v36 }
  0x8b   :  { %486 = vmatprep.subr.bf16.mxu0 %v651_v37 }
  0x8e   :  { %487 = vmatpush1.bf16.msra.mxu0 %v653_v38 }
  0x8f   :  { %488 = vmatprep.subr.bf16.mxu0 %v654_v39 }
  0x92   :  { %489 = vmatpush1.bf16.msra.mxu0 %v656_v40 }
  0x93   :  { %490 = vmatprep.subr.bf16.mxu0 %v657_v41 }
  0x96   :  { %491 = vmatpush1.bf16.msra.mxu0 %v659_v42 }
  0x97   :  { %492 = vmatprep.subr.bf16.mxu0 %v660_v43 }
  0x9a   :  { %493 = vmatpush1.bf16.msra.mxu0 %v662_v44 }
 0x135   :  { %v169_v47 = vpop.f32.mrb[0].mxu1 }
 0x136   :  { %v171_v48 = vpop.f32.mrb[1].mxu1 }
 0x137   :  { %v173_v49 = vpop.f32.mrb[2].mxu1 }
 0x138   :  { %v174_v50 = vpop.f32.mrb[3].mxu1 }
 0x13d   :  { %v233_v55 = vpop.f32.mrb[4].mxu1 }
 0x13e   :  { %v234_v57 = vadd.f32 %v233_v55, %v169_v47  ;;  %v235_v58 = vpop.f32.mrb[5].mxu1 }
 0x13f   :  { %v236_v59 = vadd.f32 %v235_v58, %v171_v48  ;;  %v237_v60 = vpop.f32.mrb[6].mxu1 }
 0x140   :  { %v252_v61 = vadd.f32 %v245_v54, %v234_v57  ;;  %v238_v62 = vpop.f32.mrb[7].mxu1 }
 0x141   :  { %v253_v63 = vadd.f32 %v249_v56, %v236_v59 }
 0x142   :  { %v254_v0 = vmax.f32 %v252_v61, 0.0 }
 0x143   :  { %v255_v1 = vmax.f32 %v253_v63, 0.0 }
 0x144   :  { %v256_v3 = vpack.c.bf16 %v254_v0, %v254_v0 }
 0x145   :  { %v257_v2 = vpack.c.bf16 %v255_v1, %v255_v1 }
 0x147   :  { %494 = vmatprep.mubr.bf16.mxu0 %v257_v2 }
 0x148   :  { %495 = vmatmul.mubr.bf16.vlgmr.msra.gmra.mrb[0].mxu0 %v256_v3 }
 0x21b   :  { %v496_v8 = vpop.f32.mrb[0].mxu0 }
 0x21c   :  { %v497_v9 = vadd.f32 %v496_v8, %v295_v5  ;;  %v498_v10 = vpop.f32.mrb[1].mxu0 }
 0x21d   :  { %v499_v12 = vadd.f32 %v498_v10, %v299_v6  ;;  %v500_v13 = vpop.f32.mrb[2].mxu0 }
 0x21e   :  { %v503_v15 = vmax.f32 %v497_v9, 0.0  ;;  %v501_v16 = vpop.f32.mrb[3].mxu0 }
 0x21f   :  { %v504_v17 = vmax.f32 %v499_v12, 0.0 }
 0x220   :  { %v517_v18 = vmul.f32 %v510_v11, %v503_v15 }
 0x221   :  { %v518_v19 = vmul.f32 %v514_v14, %v504_v17 }
 0x223   :  { %v519_v20 = vadd.f32 %v518_v19, %v517_v18 }
 0x225   :  { %520 = vadd.xlane.f32.xlu0 %v519_v20 }
 0x2b2   :  { %v521_v24 = vpop.xlane.xlu0 %520 }
 0x2b3   :  { %v524_v25 = vadd.f32 %v523_v22, %v521_v24 }
 0x2b5   :  { %v531_v26 = vrot.slane %v524_v25, %v530_v23 }
 0x2b7   :  { %534 = vst.msk [vmem:[#allocation12] sm:$0x1] %vm533_vm1, %v531_v26 }
 0x2b8   :  { %784 = shalt.err (!%p781_p2)
}
 0x2b9   :  { %s785_s8 = scalar_lea.hbm %s966_s9, 16 }
 0x2ba   :  { %p786_p3 = scmp.ne.s32.totalorder %s966_s9, %s785_s8  ;;  %p789_p4 = scmp.lt.u32.totalorder %s785_s8, %s966_s9 }
 0x2bc   :  { %p791_p5 = pnand %p789_p4, %p786_p3 }
 0x2be   :  { %794 = shalt.err (!%p791_p5)
}
 0x2bf   :  { %544 = dma.vmem_to_hbm [thread:$0]  %s542_s29, 16, %s966_s9, [#allocation5]  }
 0x2c0   :  { %801 = dma.done.wait [#allocation5], 16  }
 0x2c1   :  { %802 = vsyncadd [#allocation5], 4294967280 }
 0x2c2   :  { %548 = vsyncpa [#allocation4], 1 }
 0x2c3   :  { %549 = vsyncpa [#allocation7], 1 }
 0x2c4   :  { %550 = vsyncpa [#allocation10], 1 }
 0x2c5   :  { %551 = vsyncpa [#allocation5], 1 }

</bundles_post_ra>
